<compile_context>
chip_gen: v6e
topology: v6e:2x2x1
jax: 0.10.0
libtpu: 0.0.40
codegen_flags: <defaults>
</compile_context>

<pallas_src>
import functools
import math

import jax
import jax.numpy as jnp
from jax.experimental import pallas as pl
from jax.experimental.pallas import tpu as pltpu


# ---------------------------------------------------------------------------
# Kernel bodies
# ---------------------------------------------------------------------------

def _epilogue(y, b, *, scale, lr_mul, fused_act, negative_slope, act_gain):
    y = y * scale + b.astype(jnp.float32) * lr_mul
    if fused_act:
        # fused_leaky_relu: leaky_relu(y + b*lr_mul, 0.2) * sqrt(2)
        y = jnp.where(y >= 0.0, y, y * negative_slope) * act_gain
    return y


def _single_step_kernel(x_ref, w_ref, b_ref, o_ref, *, scale, lr_mul,
                        fused_act, negative_slope, act_gain):
    """Weight-resident fast path: full-K, full-N block; no accumulator."""
    y = jax.lax.dot_general(
        x_ref[...], w_ref[...],
        dimension_numbers=(((1,), (1,)), ((), ())),   # contract last dims; no W transpose
        preferred_element_type=jnp.float32)
    y = _epilogue(y, b_ref[...], scale=scale, lr_mul=lr_mul,
                  fused_act=fused_act, negative_slope=negative_slope,
                  act_gain=act_gain)
    o_ref[...] = y.astype(o_ref.dtype)


def _tiled_kernel(x_ref, w_ref, b_ref, o_ref, *scratch, scale, lr_mul,
                  fused_act, negative_slope, act_gain):
    """General (M, N, K) tiled path.  Accumulates into o_ref when it is f32."""
    acc_ref = scratch[0] if scratch else o_ref
    k = pl.program_id(2)

    @pl.when(k == 0)
    def _():
        acc_ref[...] = jnp.zeros_like(acc_ref)

    acc_ref[...] += jax.lax.dot_general(
        x_ref[...], w_ref[...],
        dimension_numbers=(((1,), (1,)), ((), ())),
        preferred_element_type=jnp.float32)

    @pl.when(k == pl.num_programs(2) - 1)
    def _():
        y = _epilogue(acc_ref[...].astype(jnp.float32), b_ref[...],
                      scale=scale, lr_mul=lr_mul, fused_act=fused_act,
                      negative_slope=negative_slope, act_gain=act_gain)
        o_ref[...] = y.astype(o_ref.dtype)


# ---------------------------------------------------------------------------
# Tiling heuristics
# ---------------------------------------------------------------------------

def _cdiv(a, b):
    return -(-a // b)


def _tile_candidates(dim):
    """Preference-ordered tile sizes for an M/N axis (padding-aware)."""
    if dim <= 256:
        return [dim]                     # single full-extent block (no padding)

    def key(t):
        steps = _cdiv(dim, t)
        over = steps * t - dim
        # minimize overshoot, prefer >=2 tiles (v7x megacore), prefer bigger tile
        return (over, 0 if steps >= 2 else 1, -t)

    return sorted((512, 256, 128), key=key)


def _path1_bytes(tm, M, N, K, in_bytes, out_bytes):
    grid_m = _cdiv(M, tm)
    x_bufs = 3 if grid_m >= 3 else 2          # Buffered(3) in the streaming regime
    return (x_bufs * tm * K * in_bytes        # streamed x tiles
            + 2 * N * K * in_bytes            # resident weight (buffer pair)
            + 2 * tm * N * out_bytes          # output tile
            + 2 * N * 4)                      # bias


def _path2_bytes(tm, tn, tk, in_bytes, out_bytes, use_scratch):
    b = (2 * tm * tk * in_bytes + 2 * tn * tk * in_bytes
         + 2 * tm * tn * out_bytes + 2 * tn * 4)
    if use_scratch:
        b += tm * tn * 4
    return b


# ---------------------------------------------------------------------------
# Wrapper
# ---------------------------------------------------------------------------

def equal_linear_forward(x, weight, bias=None, *, lr_mul=1.0, activation=None,
                         negative_slope=0.2, act_gain=math.sqrt(2.0),
                         vmem_budget_bytes=20 * 1024 * 1024):
    """Forward of EqualLinear.

    x: (..., in_dim); weight: (out_dim, in_dim); bias: (out_dim,) or None.
    """
    *lead, in_dim = x.shape
    out_dim, in_dim_w = weight.shape
    assert in_dim == in_dim_w, (in_dim, in_dim_w)

    scale = (1.0 / math.sqrt(in_dim)) * lr_mul
    M = math.prod(lead)
    K, N = in_dim, out_dim

    x2 = x.reshape(M, K)
    if weight.dtype != x2.dtype:
        weight = weight.astype(x2.dtype)      # MXU operands in the input dtype
    if bias is None:
        bias = jnp.zeros((N,), dtype=jnp.float32)
    bias2 = bias.astype(jnp.float32).reshape(1, N)

    out_dtype = x2.dtype
    in_bytes = x2.dtype.itemsize
    out_bytes = jnp.dtype(out_dtype).itemsize

    kernel_params = dict(scale=float(scale), lr_mul=float(lr_mul),
                         fused_act=(activation is not None),
                         negative_slope=float(negative_slope),
                         act_gain=float(act_gain))

    cost = pl.CostEstimate(
        flops=2 * M * N * K,
        transcendentals=0,
        bytes_accessed=(M * K + N * K) * in_bytes + M * N * out_bytes)

    compiler_kw = dict(vmem_limit_bytes=48 * 1024 * 1024)

    # ---- Path 1: weight-resident, full-K / full-N blocks, grid over M only ----
    tm1 = None
    for cand in _tile_candidates(M):
        if _path1_bytes(cand, M, N, K, in_bytes, out_bytes) <= vmem_budget_bytes:
            tm1 = cand
            break

    if tm1 is not None:
        grid_m = _cdiv(M, tm1)
        if grid_m >= 3:
            x_spec = pl.BlockSpec((tm1, K), lambda i: (i, 0),
                                  pipeline_mode=pl.Buffered(3))
        else:
            x_spec = pl.BlockSpec((tm1, K), lambda i: (i, 0))

        out = pl.pallas_call(
            functools.partial(_single_step_kernel, **kernel_params),
            out_shape=jax.ShapeDtypeStruct((M, N), out_dtype),
            grid_spec=pltpu.PrefetchScalarGridSpec(
                num_scalar_prefetch=0,
                grid=(grid_m,),
                in_specs=[
                    x_spec,
                    pl.BlockSpec((N, K), lambda i: (0, 0)),   # resident weight
                    pl.BlockSpec((1, N), lambda i: (0, 0)),   # resident bias
                ],
                out_specs=pl.BlockSpec((tm1, N), lambda i: (i, 0)),
            ),
            compiler_params=pltpu.CompilerParams(
                dimension_semantics=("parallel",), **compiler_kw),
            cost_estimate=cost,
        )(x2, weight, bias2)
        return out.reshape(*lead, N)

    # ---- Path 2: general (M, N, K) tiled path ----
    tm = _tile_candidates(M)[0]
    tn = _tile_candidates(N)[0]
    use_scratch = not (out_dtype == jnp.float32)

    tk = None
    Kp = K
    for cand in (2048, 1024, 512, 256, 128):
        if K % cand == 0 and _path2_bytes(tm, tn, cand, in_bytes, out_bytes,
                                          use_scratch) <= vmem_budget_bytes:
            tk = cand
            break
    if tk is None:
        if K % 128 == 0:
            tk = 128                      # smallest legal K tile; budget is soft
        else:
            # Correctness fallback: K tail would corrupt the accumulation, so
            # pad x and weight along K with explicit zeros.
            tk = 128
            Kp = _cdiv(K, 128) * 128
            x2 = jnp.pad(x2, ((0, 0), (0, Kp - K)))
            weight = jnp.pad(weight, ((0, 0), (0, Kp - K)))

    grid = (_cdiv(M, tm), _cdiv(N, tn), Kp // tk)
    scratch_shapes = [pltpu.VMEM((tm, tn), jnp.float32)] if use_scratch else []

    out = pl.pallas_call(
        functools.partial(_tiled_kernel, **kernel_params),
        out_shape=jax.ShapeDtypeStruct((M, N), out_dtype),
        grid_spec=pltpu.PrefetchScalarGridSpec(
            num_scalar_prefetch=0,
            grid=grid,
            in_specs=[
                pl.BlockSpec((tm, tk), lambda i, j, k: (i, k)),   # x tile
                pl.BlockSpec((tn, tk), lambda i, j, k: (j, k)),   # weight tile
                pl.BlockSpec((1, tn), lambda i, j, k: (0, j)),    # bias tile
            ],
            out_specs=pl.BlockSpec((tm, tn), lambda i, j, k: (i, j)),
            scratch_shapes=scratch_shapes,
        ),
        compiler_params=pltpu.CompilerParams(
            dimension_semantics=("parallel", "parallel", "arbitrary"),
            **compiler_kw),
        cost_estimate=cost,
    )(x2, weight, bias2)
    return out.reshape(*lead, N)


# ---------------------------------------------------------------------------
# Self-test
# ---------------------------------------------------------------------------

if __name__ == "__main__":
    key = jax.random.PRNGKey(0)
    k1, k2, k3, k4 = jax.random.split(key, 4)

    def reference(x, w, b, *, lr_mul, activation):
        scale = (1.0 / math.sqrt(x.shape[-1])) * lr_mul
        y = jnp.einsum("...i,oi->...o", x.astype(jnp.float32),
                       (w.astype(jnp.float32) * scale)) + b * lr_mul
        if activation:
            y = jnp.where(y >= 0.0, y, 0.2 * y) * math.sqrt(2.0)
        return y

    # --- Test 1: module-like small shape (single-shot weight-resident path) ---
    batch, seq, in_dim, out_dim = 2, 8, 32, 32
    lr_mul = 0.5
    x = jax.random.normal(k1, (batch, seq, in_dim), dtype=jnp.float32)
    # nn.Parameter(torch.randn(out_dim, in_dim).div_(lr_mul))
    w = jax.random.normal(k2, (out_dim, in_dim), dtype=jnp.float32) / lr_mul
    # nn.Parameter(torch.zeros(out_dim).fill_(bias_init))
    b = jnp.full((out_dim,), 0.1, dtype=jnp.float32)

    lin = jax.jit(functools.partial(equal_linear_forward, lr_mul=lr_mul,
                                    activation=None))
    act = jax.jit(functools.partial(equal_linear_forward, lr_mul=lr_mul,
                                    activation="fused_lrelu"))
    o1 = lin(x, w, b)
    o2 = act(x, w, b)
    jax.block_until_ready((o1, o2))
    assert o1.shape == (batch, seq, out_dim) and o1.dtype == jnp.float32
    assert jnp.allclose(o1, reference(x, w, b, lr_mul=lr_mul, activation=None),
                        rtol=1e-5, atol=1e-5)
    assert jnp.allclose(o2, reference(x, w, b, lr_mul=lr_mul,
                                      activation="fused_lrelu"),
                        rtol=1e-5, atol=1e-5)

    # --- Test 2: streaming-M weight-resident path (Buffered(3) x stream) ---
    M2, K2, N2 = 768, 256, 256
    xs = jax.random.normal(k3, (2, M2 // 2, K2), dtype=jnp.float32)
    ws = jax.random.normal(k4, (N2, K2), dtype=jnp.float32)
    bs = jnp.linspace(-1.0, 1.0, N2, dtype=jnp.float32)
    act2 = jax.jit(functools.partial(equal_linear_forward, lr_mul=1.0,
                                     activation="fused_lrelu"))
    o3 = act2(xs, ws, bs)
    jax.block_until_ready(o3)
    assert o3.shape == (2, M2 // 2, N2)
    assert jnp.allclose(o3, reference(xs, ws, bs, lr_mul=1.0,
                                      activation="fused_lrelu"),
                        rtol=1e-5, atol=1e-4)

    # --- Test 3: force the general tiled (M, N, K) path with ragged M / N ---
    M3, K3, N3 = 200, 512, 320
    x3 = jax.random.normal(k1, (M3, K3), dtype=jnp.float32)
    w3 = jax.random.normal(k2, (N3, K3), dtype=jnp.float32)
    b3 = jnp.full((N3,), 0.25, dtype=jnp.float32)
    tiled = jax.jit(functools.partial(equal_linear_forward, lr_mul=1.0,
                                      activation=None,
                                      vmem_budget_bytes=1 * 1024 * 1024))
    o4 = tiled(x3, w3, b3)
    jax.block_until_ready(o4)
    assert o4.shape == (M3, N3)
    assert jnp.allclose(o4, reference(x3, w3, b3, lr_mul=1.0, activation=None),
                        rtol=1e-5, atol=1e-4)

    # --- Test 4: bf16 operands (native MXU rate), loose tolerance ---
    bf = jax.jit(functools.partial(equal_linear_forward, lr_mul=1.0,
                                   activation=None))
    o5 = bf(xs.astype(jnp.bfloat16), ws.astype(jnp.bfloat16), bs)
    jax.block_until_ready(o5)
    assert o5.dtype == jnp.bfloat16
    assert jnp.allclose(o5.astype(jnp.float32),
                        reference(xs, ws, bs, lr_mul=1.0, activation=None),
                        rtol=5e-2, atol=1e-1)

    print("KERNEL_OK")
</pallas_src>

<mosaic_0001>
module attributes {stable_mosaic.version = 11 : i64} {
  func.func @_single_step_kernel(%arg0: i32, %arg1: memref<16x32xf32, #tpu.memory_space<vmem>>, %arg2: memref<32x32xf32, #tpu.memory_space<vmem>>, %arg3: memref<1x32xf32, #tpu.memory_space<vmem>>, %arg4: memref<16x32xf32, #tpu.memory_space<vmem>>) attributes {dimension_semantics = [#tpu.dimension_semantics<parallel>], iteration_bounds = array<i64: 1>, scalar_prefetch = 0 : i64, scratch_operands = 0 : i64, tpu.core_type = #tpu.core_type<tc>, window_params = [{transform_indices = @transform_0, window_bounds = array<i64: 16, 32>}, {pipeline_mode = #tpu.pipeline_mode<synchronous>, transform_indices = @transform_1, window_bounds = array<i64: 32, 32>}, {pipeline_mode = #tpu.pipeline_mode<synchronous>, transform_indices = @transform_2, window_bounds = array<i64: 1, 32>}, {transform_indices = @transform_3, window_bounds = array<i64: 16, 32>}]} {
    %c0 = arith.constant 0 : index
    %c0_0 = arith.constant 0 : index
    %0 = vector.load %arg1[%c0, %c0_0] : memref<16x32xf32, #tpu.memory_space<vmem>>, vector<16x32xf32>
    %c0_1 = arith.constant 0 : index
    %c0_2 = arith.constant 0 : index
    %1 = vector.load %arg2[%c0_1, %c0_2] : memref<32x32xf32, #tpu.memory_space<vmem>>, vector<32x32xf32>
    %cst = arith.constant dense<0.000000e+00> : vector<16x32xf32>
    %2 = tpu.matmul %0, %1, %cst {dimension_numbers = #tpu.dot_dimension_numbers<[1], [1], [0], [0], [0, 0, 1, 0], [], []>} : vector<16x32xf32>, vector<32x32xf32>, vector<16x32xf32> -> vector<16x32xf32>
    %c0_3 = arith.constant 0 : index
    %c0_4 = arith.constant 0 : index
    %3 = vector.load %arg3[%c0_3, %c0_4] : memref<1x32xf32, #tpu.memory_space<vmem>>, vector<1x32xf32>
    %cst_5 = arith.constant 0.0883883461 : f32
    %4 = vector.broadcast %cst_5 : f32 to vector<16x32xf32>
    %5 = arith.mulf %2, %4 : vector<16x32xf32>
    %cst_6 = arith.constant 5.000000e-01 : f32
    %6 = vector.broadcast %cst_6 : f32 to vector<1x32xf32>
    %7 = arith.mulf %3, %6 : vector<1x32xf32>
    %8 = vector.broadcast %7 : vector<1x32xf32> to vector<16x32xf32>
    %9 = arith.addf %5, %8 : vector<16x32xf32>
    %c0_7 = arith.constant 0 : index
    %c0_8 = arith.constant 0 : index
    %10 = vector.load %arg4[%c0_7, %c0_8] : memref<16x32xf32, #tpu.memory_space<vmem>>, vector<16x32xf32>
    tpu.vector_store %arg4[%c0_7, %c0_8], %9 {strides = array<i32>} : memref<16x32xf32, #tpu.memory_space<vmem>>, vector<16x32xf32>,
    return
  }
  func.func @transform_0(%arg0: i32) -> (i32, i32) {
    %c0_i32 = arith.constant 0 : i32
    %c0_i32_0 = arith.constant 0 : i32
    return %arg0, %c0_i32 : i32, i32
  }
  func.func @transform_1(%arg0: i32) -> (i32, i32) {
    %c0_i32 = arith.constant 0 : i32
    %c0_i32_0 = arith.constant 0 : i32
    %c0_i32_1 = arith.constant 0 : i32
    return %c0_i32, %c0_i32_0 : i32, i32
  }
  func.func @transform_2(%arg0: i32) -> (i32, i32) {
    %c0_i32 = arith.constant 0 : i32
    %c0_i32_0 = arith.constant 0 : i32
    %c0_i32_1 = arith.constant 0 : i32
    return %c0_i32, %c0_i32_0 : i32, i32
  }
  func.func @transform_3(%arg0: i32) -> (i32, i32) {
    %c0_i32 = arith.constant 0 : i32
    %c0_i32_0 = arith.constant 0 : i32
    return %arg0, %c0_i32 : i32, i32
  }
}

</mosaic_0001>

<bundles_post_ra>
// kernel: equal_linear_forward.1
= control target key start
LH: loop header
LB: loop body
LE: loop exit
PB: predicated region body
PF: predicated region fallthrough
CT: control target
= control target key end

     0   :  { %8 = vsyncpa [#allocation3], 0  ;;  %s327_s0 = inlined_call_operand.hbm [shape: f32[16,32], index: 0, kind: input, shape index: {}]   ;;  %s328_s1 = inlined_call_operand.hbm [shape: f32[32,32], index: 1, kind: input, shape index: {}]   ;;  %s329_s2 = inlined_call_operand.vmem [shape: f32[1,32], index: 2, kind: input, shape index: {}]   ;;  %s330_s3 = inlined_call_operand.hbm [shape: f32[16,32], index: 3, kind: output, shape index: {}]  }
   0x1   :  { %9 = vsyncpa [#allocation6], 0 }
   0x2   :  { %10 = vsyncpa [#allocation4], 0  ;;  %s269_s12 = smov [#allocation2]  }
   0x3   :  { %s16_s13 = sshll.u32 %s269_s12, 4  ;;  %s17_s13 = int_to_ptr.vmem [resolvable:$true] %s16_s13 }
   0x4   :  { %s211_s14 = scalar_lea.vmem %s17_s13, 256  ;;  %p216_p1 = scmp.lt.s32.totalorder %s17_s13, %s17_s13 }
   0x5   :  { %p212_p0 = scmp.ne.s32.totalorder %s17_s13, %s211_s14  ;;  %p217_p2 = scmp.lt.s32.totalorder %s211_s14, %s211_s14 }
   0x7   :  { %p218_p3 = por %p217_p2, %p216_p1 }
   0x9   :  { %p219_p4 = pnand %p218_p3, %p212_p0 }
   0xb   :  { %222 = shalt.err (!%p219_p4)
}
   0xc   :  { %s270_s15 = smov 128   ;;  %s271_s16 = smov 8  }
   0xd   :  { %22 = dma.hbm_to_vmem [thread:$0]  %s327_s0, 256, %s17_s13, [#allocation3], %s270_s15, %s270_s15, %s271_s16  }
   0xe   :  { %s272_s19 = smov [#allocation5]  }
   0xf   :  { %s28_s20 = sshll.u32 %s272_s19, 4  ;;  %s29_s20 = int_to_ptr.vmem [resolvable:$true] %s28_s20 }
  0x10   :  { %s231_s21 = scalar_lea.vmem %s29_s20, 512  ;;  %p236_p6 = scmp.lt.s32.totalorder %s29_s20, %s29_s20 }
  0x11   :  { %p232_p5 = scmp.ne.s32.totalorder %s29_s20, %s231_s21  ;;  %p237_p7 = scmp.lt.s32.totalorder %s231_s21, %s231_s21 }
  0x13   :  { %p238_p8 = por %p237_p7, %p236_p6 }
  0x15   :  { %p239_p9 = pnand %p238_p8, %p232_p5 }
  0x17   :  { %242 = shalt.err (!%p239_p9)
}
  0x18   :  { %34 = dma.hbm_to_vmem [thread:$0]  %s328_s1, 512, %s29_s20, [#allocation6], %s270_s15, %s270_s15, %s271_s16  }
  0x19   :  { %263 = dma.done.wait [#allocation3], 256  }
  0x1a   :  { %264 = vsyncadd [#allocation3], 4294967040 }
  0x1b   :  { %265 = dma.done.wait [#allocation6], 512  }
  0x1c   :  { %266 = vsyncadd [#allocation6], 4294966784  ;;  %vm49_vm0 = vcmask 261120   ;;  %v48_v0 = vld [vmem:[#allocation5 + $0x18] sm:$0xff]  ;;  %v47_v1 = vld [vmem:[#allocation5 + $0x10] sm:$0xff]  ;;  %v148_v6 = vlaneseq  ;;  %s273_s24 = smov [#allocation7]  }
  0x1d   :  { %187 = vmatprep.subr.msk.mxu0 %vm49_vm0, %v48_v0  ;;  %v43_v2 = vld [vmem:[#allocation2] sm:$0xff]  ;;  %v46_v3 = vld [vmem:[#allocation5 + $0x8] sm:$0xff]  ;;  %v45_v4 = vld [vmem:[#allocation5] sm:$0xff]  ;;  %s162_s25 = sshll.u32 %s273_s24, 4  ;;  %s163_s25 = int_to_ptr.vmem [resolvable:$true] %s162_s25 }
  0x1e   :  { %188 = vmatpush3.xpose.msk.msra.mxu0 %vm49_vm0, %v48_v0  ;;  %195 = vmatprep.mubr.msk.f32.mxu0 %vm49_vm0, %v43_v2  ;;  %v44_v5 = vld [vmem:[#allocation2 + $0x8] sm:$0xff]  ;;  %v149_v7 = vshrl.u32 %v148_v6, 7  ;;  %v143_v8 = vld [vmem:[%s329_s2] sm:$0x1]  ;;  %s243_s26 = scalar_lea.vmem %s163_s25, 256  ;;  %p248_p11 = scmp.lt.s32.totalorder %s163_s25, %s163_s25 }
  0x1f   :  { %189 = vmatprep.subr.msk.mxu0 %vm49_vm0, %v47_v1  ;;  %v146_v9 = vmul.f32 0.5, %v143_v8  ;;  %p244_p10 = scmp.ne.s32.totalorder %s163_s25, %s243_s26  ;;  %p249_p12 = scmp.lt.s32.totalorder %s243_s26, %s243_s26 }
  0x20   :  { %v150_v10 = vsub.s32 0, %v149_v7 }
  0x21   :  { %p250_p13 = por %p249_p12, %p248_p11 }
  0x22   :  { %190 = vmatpush3.xpose.msk.msra.mxu0 %vm49_vm0, %v47_v1  ;;  %v151_v11 = vrot.slane %v146_v9, %v150_v10 }
  0x23   :  { %191 = vmatprep.subr.msk.mxu0 %vm49_vm0, %v46_v3  ;;  %p251_p0 = pnand %p250_p13, %p244_p10 }
  0x26   :  { %192 = vmatpush3.xpose.msk.msra.mxu0 %vm49_vm0, %v46_v3 }
  0x27   :  { %193 = vmatprep.subr.msk.mxu0 %vm49_vm0, %v45_v4 }
  0x2a   :  { %194 = vmatpush3.xpose.msk.msra.mxu0 %vm49_vm0, %v45_v4 }
  0x2d   :  { %196 = vmatmul.mubr.msk.f32.vlgmr.msra.gmra.mxu0 %vm49_vm0, %v44_v5 }
  0xed   :  { %v197_v12 = vpop.f32.mrf.mxu0 }
  0xee   :  { %v145_v13 = vmul.f32 0.088388346, %v197_v12 }
  0xef   :  { %v134_v14 = vpop.f32.mrf.mxu0 }
  0xf0   :  { %v154_v15 = vadd.f32 %v151_v11, %v145_v13  ;;  %v144_v16 = vmul.f32 0.088388346, %v134_v14 }
  0xf2   :  { %156 = vst.msk [vmem:[#allocation7 + $0x8] sm:$0xff] %vm49_vm0, %v154_v15  ;;  %v153_v17 = vadd.f32 %v151_v11, %v144_v16 }
  0xf4   :  { %155 = vst.msk [vmem:[#allocation7] sm:$0xff] %vm49_vm0, %v153_v17 }
  0xf5   :  { %254 = shalt.err (!%p251_p0)
}
  0xf6   :  { %168 = dma.vmem_to_hbm [thread:$0]  %s163_s25, 256, %s330_s3, [#allocation4], %s270_s15, %s270_s15, %s271_s16  }
  0xf7   :  { %267 = dma.done.wait [#allocation4], 256  }
  0xf8   :  { %268 = vsyncadd [#allocation4], 4294967040 }
  0xf9   :  { %172 = vsyncpa [#allocation3], 1 }
  0xfa   :  { %173 = vsyncpa [#allocation6], 1 }
  0xfb   :  { %174 = vsyncpa [#allocation4], 1 }

</bundles_post_ra>
